<compile_context>
chip_gen: v6e
topology: v6e:2x2x1
jax: 0.10.0
libtpu: 0.0.40
codegen_flags: <defaults>
</compile_context>

<pallas_src>
import jax
import jax.numpy as jnp
from jax.experimental import pallas as pl
from jax.experimental.pallas import tpu as pltpu

_SMOOTH = 1e-06
_ALPHA = 0.5
_BETA = 0.5

_LANES = 128
_SUBLANES = 8
_MAX_TILE_ROWS = 2048  # (2048, 128) f32 = 1 MiB per input buffer


def _tversky_partial_kernel(pred_ref, true_ref, out_ref):
    """One grid step: fold a (tile_rows, 128) block to (8, 128) partials of
    tp = p*t, sum_p and sum_t, and write them to this step's output block."""
    p = pred_ref[...].astype(jnp.float32)
    t = true_ref[...].astype(jnp.float32)

    r = p.shape[0] // _SUBLANES  # tile_rows is always a multiple of 8

    tp = (p * t).reshape(r, _SUBLANES, _LANES).sum(axis=0)
    sp = p.reshape(r, _SUBLANES, _LANES).sum(axis=0)
    st = t.reshape(r, _SUBLANES, _LANES).sum(axis=0)

    out_ref[0, 0, :, :] = tp
    out_ref[0, 1, :, :] = sp
    out_ref[0, 2, :, :] = st


def tversky_loss(y_pred, y_true, smooth=_SMOOTH, alpha=_ALPHA, beta=_BETA):
    """Pallas TPU implementation of TverskyLoss.forward. Returns a f32 scalar."""
    assert y_pred.shape == y_true.shape

    pred_flat = y_pred.reshape(-1)
    true_flat = y_true.reshape(-1)
    n = pred_flat.shape[0]

    # Choose tiling: rows of 128 lanes, rounded up to a multiple of 8
    # sublanes; one block if it all fits, otherwise (2048, 128) blocks.
    rows = -(-n // _LANES)
    rows = -(-rows // _SUBLANES) * _SUBLANES
    if rows <= _MAX_TILE_ROWS:
        tile_rows, num_blocks = rows, 1
    else:
        tile_rows = _MAX_TILE_ROWS
        num_blocks = -(-rows // tile_rows)
    rows_padded = tile_rows * num_blocks
    n_pad = rows_padded * _LANES

    # Zero padding is exact for this loss (padded elements add 0 to every
    # partial sum). Only materialize a padded copy when actually required.
    if n_pad != n:
        pred_flat = jnp.pad(pred_flat, (0, n_pad - n))
        true_flat = jnp.pad(true_flat, (0, n_pad - n))

    pred2d = pred_flat.reshape(rows_padded, _LANES)
    true2d = true_flat.reshape(rows_padded, _LANES)

    partials = pl.pallas_call(
        _tversky_partial_kernel,
        out_shape=jax.ShapeDtypeStruct(
            (num_blocks, 3, _SUBLANES, _LANES), jnp.float32),
        grid_spec=pltpu.PrefetchScalarGridSpec(
            num_scalar_prefetch=0,
            grid=(num_blocks,),
            in_specs=[
                pl.BlockSpec((tile_rows, _LANES), lambda i: (i, 0)),
                pl.BlockSpec((tile_rows, _LANES), lambda i: (i, 0)),
            ],
            out_specs=pl.BlockSpec(
                (1, 3, _SUBLANES, _LANES), lambda i: (i, 0, 0, 0)),
        ),
        compiler_params=pltpu.CompilerParams(
            dimension_semantics=("parallel",)),
    )(pred2d, true2d)

    # Tiny final combine in XLA (num_blocks * 12 KiB of partials).
    sums = jnp.sum(partials, axis=(0, 2, 3))
    tp = sums[0]
    fp = sums[1] - tp  # sum(p) - tp == sum(p * (1 - t))
    fn = sums[2] - tp  # sum(t) - tp == sum((1 - p) * t)
    tversky = tp / (tp + alpha * fn + beta * fp + smooth)
    return 1.0 - tversky


def _tversky_loss_ref(y_pred, y_true, smooth=_SMOOTH, alpha=_ALPHA, beta=_BETA):
    p = jnp.ravel(y_pred).astype(jnp.float32)
    t = jnp.ravel(y_true).astype(jnp.float32)
    tp = jnp.sum(p * t)
    fp = jnp.sum(p * (1.0 - t))
    fn = jnp.sum((1.0 - p) * t)
    return 1.0 - tp / (tp + alpha * fn + beta * fp + smooth)


if __name__ == "__main__":
    key = jax.random.PRNGKey(0)
    k1, k2 = jax.random.split(key)

    # Small shapes consistent with a segmentation use-case (NCHW).
    shape = (2, 4, 16, 16)
    y_pred = jax.nn.sigmoid(jax.random.normal(k1, shape, dtype=jnp.float32))
    y_true = (jax.random.uniform(k2, shape) > 0.5).astype(jnp.float32)

    loss = tversky_loss(y_pred, y_true)
    loss = jax.block_until_ready(loss)

    ref = _tversky_loss_ref(y_pred, y_true)
    assert jnp.allclose(loss, ref, rtol=1e-5, atol=1e-6), (loss, ref)

    print("KERNEL_OK")
</pallas_src>

<mosaic_0001>
module attributes {stable_mosaic.version = 11 : i64} {
  func.func @_tversky_partial_kernel(%arg0: i32, %arg1: memref<16x128xf32, #tpu.memory_space<vmem>>, %arg2: memref<16x128xf32, #tpu.memory_space<vmem>>, %arg3: memref<1x3x8x128xf32, #tpu.memory_space<vmem>>) attributes {dimension_semantics = [#tpu.dimension_semantics<parallel>], iteration_bounds = array<i64: 1>, scalar_prefetch = 0 : i64, scratch_operands = 0 : i64, tpu.core_type = #tpu.core_type<tc>, window_params = [{transform_indices = @transform_0, window_bounds = array<i64: 16, 128>}, {transform_indices = @transform_1, window_bounds = array<i64: 16, 128>}, {transform_indices = @transform_2, window_bounds = array<i64: 1, 3, 8, 128>}]} {
    %c0 = arith.constant 0 : index
    %c0_0 = arith.constant 0 : index
    %0 = vector.load %arg1[%c0, %c0_0] : memref<16x128xf32, #tpu.memory_space<vmem>>, vector<16x128xf32>
    %c0_1 = arith.constant 0 : index
    %c0_2 = arith.constant 0 : index
    %1 = vector.load %arg2[%c0_1, %c0_2] : memref<16x128xf32, #tpu.memory_space<vmem>>, vector<16x128xf32>
    %2 = arith.mulf %0, %1 : vector<16x128xf32>
    %3 = vector.shape_cast %2 : vector<16x128xf32> to vector<2x8x128xf32>
    %cst = arith.constant dense<0.000000e+00> : vector<8x128xf32>
    %4 = vector.multi_reduction <add>, %3, %cst [0] : vector<2x8x128xf32> to vector<8x128xf32>
    %5 = vector.shape_cast %0 : vector<16x128xf32> to vector<2x8x128xf32>
    %cst_3 = arith.constant dense<0.000000e+00> : vector<8x128xf32>
    %6 = vector.multi_reduction <add>, %5, %cst_3 [0] : vector<2x8x128xf32> to vector<8x128xf32>
    %7 = vector.shape_cast %1 : vector<16x128xf32> to vector<2x8x128xf32>
    %cst_4 = arith.constant dense<0.000000e+00> : vector<8x128xf32>
    %8 = vector.multi_reduction <add>, %7, %cst_4 [0] : vector<2x8x128xf32> to vector<8x128xf32>
    %c0_5 = arith.constant 0 : index
    %c0_6 = arith.constant 0 : index
    %c0_7 = arith.constant 0 : index
    %c0_8 = arith.constant 0 : index
    %9 = vector.load %arg3[%c0_5, %c0_6, %c0_7, %c0_8] : memref<1x3x8x128xf32, #tpu.memory_space<vmem>>, vector<1x1x8x128xf32>
    %10 = vector.shape_cast %9 : vector<1x1x8x128xf32> to vector<8x128xf32>
    %11 = vector.shape_cast %4 : vector<8x128xf32> to vector<1x1x8x128xf32>
    tpu.vector_store %arg3[%c0_5, %c0_6, %c0_7, %c0_8], %11 {strides = array<i32>} : memref<1x3x8x128xf32, #tpu.memory_space<vmem>>, vector<1x1x8x128xf32>,
    %c0_9 = arith.constant 0 : index
    %c1 = arith.constant 1 : index
    %c0_10 = arith.constant 0 : index
    %c0_11 = arith.constant 0 : index
    %12 = vector.load %arg3[%c0_9, %c1, %c0_10, %c0_11] : memref<1x3x8x128xf32, #tpu.memory_space<vmem>>, vector<1x1x8x128xf32>
    %13 = vector.shape_cast %12 : vector<1x1x8x128xf32> to vector<8x128xf32>
    %14 = vector.shape_cast %6 : vector<8x128xf32> to vector<1x1x8x128xf32>
    tpu.vector_store %arg3[%c0_9, %c1, %c0_10, %c0_11], %14 {strides = array<i32>} : memref<1x3x8x128xf32, #tpu.memory_space<vmem>>, vector<1x1x8x128xf32>,
    %c0_12 = arith.constant 0 : index
    %c2 = arith.constant 2 : index
    %c0_13 = arith.constant 0 : index
    %c0_14 = arith.constant 0 : index
    %15 = vector.load %arg3[%c0_12, %c2, %c0_13, %c0_14] : memref<1x3x8x128xf32, #tpu.memory_space<vmem>>, vector<1x1x8x128xf32>
    %16 = vector.shape_cast %15 : vector<1x1x8x128xf32> to vector<8x128xf32>
    %17 = vector.shape_cast %8 : vector<8x128xf32> to vector<1x1x8x128xf32>
    tpu.vector_store %arg3[%c0_12, %c2, %c0_13, %c0_14], %17 {strides = array<i32>} : memref<1x3x8x128xf32, #tpu.memory_space<vmem>>, vector<1x1x8x128xf32>,
    return
  }
  func.func @transform_0(%arg0: i32) -> (i32, i32) {
    %c0_i32 = arith.constant 0 : i32
    %c0_i32_0 = arith.constant 0 : i32
    return %arg0, %c0_i32 : i32, i32
  }
  func.func @transform_1(%arg0: i32) -> (i32, i32) {
    %c0_i32 = arith.constant 0 : i32
    %c0_i32_0 = arith.constant 0 : i32
    return %arg0, %c0_i32 : i32, i32
  }
  func.func @transform_2(%arg0: i32) -> (i32, i32, i32, i32) {
    %c0_i32 = arith.constant 0 : i32
    %c0_i32_0 = arith.constant 0 : i32
    %c0_i32_1 = arith.constant 0 : i32
    %c0_i32_2 = arith.constant 0 : i32
    return %arg0, %c0_i32, %c0_i32_0, %c0_i32_1 : i32, i32, i32, i32
  }
}

</mosaic_0001>

<bundles_post_ra>
// kernel: tpu_custom_call.1
= control target key start
LH: loop header
LB: loop body
LE: loop exit
PB: predicated region body
PF: predicated region fallthrough
CT: control target
= control target key end

     0   :  { %7 = vsyncpa [#allocation3], 0  ;;  %s181_s0 = inlined_call_operand.hbm [shape: f32[16,128], index: 0, kind: input, shape index: {}]   ;;  %s182_s1 = inlined_call_operand.hbm [shape: f32[16,128], index: 1, kind: input, shape index: {}]   ;;  %s183_s2 = inlined_call_operand.hbm [shape: f32[1,3,8,128], index: 2, kind: output, shape index: {}]  }
   0x1   :  { %8 = vsyncpa [#allocation6], 0 }
   0x2   :  { %9 = vsyncpa [#allocation4], 0  ;;  %s143_s9 = smov [#allocation2]  }
   0x3   :  { %s15_s10 = sshll.u32 %s143_s9, 4  ;;  %s16_s10 = int_to_ptr.vmem [resolvable:$true] %s15_s10 }
   0x4   :  { %s85_s11 = scalar_lea.vmem %s16_s10, 256  ;;  %p90_p1 = scmp.lt.s32.totalorder %s16_s10, %s16_s10 }
   0x5   :  { %p86_p0 = scmp.ne.s32.totalorder %s16_s10, %s85_s11  ;;  %p91_p2 = scmp.lt.s32.totalorder %s85_s11, %s85_s11 }
   0x7   :  { %p92_p3 = por %p91_p2, %p90_p1 }
   0x9   :  { %p93_p4 = pnand %p92_p3, %p86_p0 }
   0xb   :  { %96 = shalt.err (!%p93_p4)
}
   0xc   :  { %s144_s12 = smov 128   ;;  %s145_s13 = smov 8  }
   0xd   :  { %21 = dma.hbm_to_vmem [thread:$0]  %s181_s0, 256, %s16_s10, [#allocation3], %s144_s12, %s144_s12, %s145_s13  }
   0xe   :  { %s146_s16 = smov [#allocation5]  }
   0xf   :  { %s27_s17 = sshll.u32 %s146_s16, 4  ;;  %s28_s17 = int_to_ptr.vmem [resolvable:$true] %s27_s17 }
  0x10   :  { %s105_s18 = scalar_lea.vmem %s28_s17, 256  ;;  %p110_p6 = scmp.lt.s32.totalorder %s28_s17, %s28_s17 }
  0x11   :  { %p106_p5 = scmp.ne.s32.totalorder %s28_s17, %s105_s18  ;;  %p111_p7 = scmp.lt.s32.totalorder %s105_s18, %s105_s18 }
  0x13   :  { %p112_p8 = por %p111_p7, %p110_p6 }
  0x15   :  { %p113_p9 = pnand %p112_p8, %p106_p5 }
  0x17   :  { %116 = shalt.err (!%p113_p9)
}
  0x18   :  { %33 = dma.hbm_to_vmem [thread:$0]  %s182_s1, 256, %s28_s17, [#allocation6], %s144_s12, %s144_s12, %s145_s13  }
  0x19   :  { %137 = dma.done.wait [#allocation3], 256  }
  0x1a   :  { %138 = vsyncadd [#allocation3], 4294967040 }
  0x1b   :  { %139 = dma.done.wait [#allocation6], 256  }
  0x1c   :  { %140 = vsyncadd [#allocation6], 4294967040  ;;  %v40_v0 = vld [vmem:[#allocation2] sm:$0xff]  ;;  %v41_v1 = vld [vmem:[#allocation2 + $0x8] sm:$0xff]  ;;  %s147_s0 = smov [#allocation7]  }
  0x1d   :  { %v42_v2 = vld [vmem:[#allocation5] sm:$0xff]  ;;  %v43_v3 = vld [vmem:[#allocation5 + $0x8] sm:$0xff]  ;;  %v47_v5 = vadd.f32 %v41_v1, %v40_v0  ;;  %s59_s21 = sshll.u32 %s147_s0, 4  ;;  %s60_s21 = int_to_ptr.vmem [resolvable:$true] %s59_s21 }
  0x1e   :  { %v44_v4 = vmul.f32 %v42_v2, %v40_v0  ;;  %v45_v6 = vmul.f32 %v43_v3, %v41_v1  ;;  %v48_v7 = vadd.f32 %v43_v3, %v42_v2  ;;  %s117_s1 = scalar_lea.vmem %s60_s21, 384  ;;  %p122_p11 = scmp.lt.s32.totalorder %s60_s21, %s60_s21 }
  0x1f   :  { %51 = vst [vmem:[#allocation7 + $0x8] sm:$0xff] %v47_v5  ;;  %p118_p10 = scmp.ne.s32.totalorder %s60_s21, %s117_s1  ;;  %p123_p12 = scmp.lt.s32.totalorder %s117_s1, %s117_s1 }
  0x20   :  { %v46_v8 = vadd.f32 %v45_v6, %v44_v4  ;;  %53 = vst [vmem:[#allocation7 + $0x10] sm:$0xff] %v48_v7 }
  0x21   :  { %p124_p13 = por %p123_p12, %p122_p11 }
  0x22   :  { %49 = vst [vmem:[#allocation7] sm:$0xff] %v46_v8 }
  0x23   :  { %p125_p0 = pnand %p124_p13, %p118_p10 }
  0x25   :  { %128 = shalt.err (!%p125_p0)
}
  0x26   :  { %65 = dma.vmem_to_hbm [thread:$0]  %s60_s21, 384, %s183_s2, [#allocation4], %s144_s12, %s144_s12, %s145_s13  }
  0x27   :  { %141 = dma.done.wait [#allocation4], 384  }
  0x28   :  { %142 = vsyncadd [#allocation4], 4294966912 }
  0x29   :  { %69 = vsyncpa [#allocation3], 1 }
  0x2a   :  { %70 = vsyncpa [#allocation6], 1 }
  0x2b   :  { %71 = vsyncpa [#allocation4], 1 }

</bundles_post_ra>
